<compile_context>
chip_gen: v5e
topology: v5e:2x2
jax: 0.10.0
libtpu: 0.0.40
codegen_flags: <defaults>
</compile_context>

<pallas_src>
import functools

import jax
import jax.numpy as jnp
from jax import lax
from jax.experimental import pallas as pl
from jax.experimental.pallas import tpu as pltpu


def _vmem_limit_bytes(default=48 * 1024 * 1024):
    """Per-chip VMEM budget: 85% of physical (v5e/v6e: 128 MiB, v7x: 64 MiB)."""
    try:
        cap = int(pltpu.get_tpu_info().vmem_capacity_bytes)
        return int(cap * 0.85)
    except Exception:
        return default


# --------------------------------------------------------------------------
# Kernel 1: fused MLP  relu(Xt @ W1^T + b1) @ W2^T + b2, tiled over nodes
# --------------------------------------------------------------------------
def mlp_kernel(xt_ref, w1t_ref, b1_ref, w2t_ref, b2_ref, o_ref):
    h = jnp.dot(xt_ref[...], w1t_ref[...], preferred_element_type=jnp.float32) + b1_ref[...]
    h = jnp.maximum(h, 0.0)
    o_ref[...] = (jnp.dot(h, w2t_ref[...], preferred_element_type=jnp.float32)
                  + b2_ref[...]).astype(o_ref.dtype)


def mlp_forward(xt, w1t, b1, w2t, b2, *, tn=2048):
    n, m_in = xt.shape
    nhid = w1t.shape[1]
    tn = min(tn, n)
    return pl.pallas_call(
        mlp_kernel,
        out_shape=jax.ShapeDtypeStruct((n, nhid), jnp.float32),
        grid=(pl.cdiv(n, tn),),
        in_specs=[pl.BlockSpec((tn, m_in), lambda j: (j, 0)),
                  pl.BlockSpec((m_in, nhid), lambda j: (0, 0)),
                  pl.BlockSpec((1, nhid), lambda j: (0, 0)),
                  pl.BlockSpec((nhid, nhid), lambda j: (0, 0)),
                  pl.BlockSpec((1, nhid), lambda j: (0, 0))],
        out_specs=pl.BlockSpec((tn, nhid), lambda j: (j, 0)),
        compiler_params=pltpu.CompilerParams(
            dimension_semantics=("parallel",),
            vmem_limit_bytes=_vmem_limit_bytes()),
    )(xt, w1t, b1, w2t, b2)


# --------------------------------------------------------------------------
# Kernel 2: fused MGNNI_m fixed-point solve over ALL K scales.
#   grid=(K,), "parallel"; adj lives in HBM (memory_space=ANY) and is staged
#   into a single VMEM scratch.  Transposed-space iteration (W = Z^T, H = X^T):
#       W_{t+1} = gamma * (adj^k @ W_t) @ G + H ,  G = F^T F / (||F^T F||_F + 1e-12)
#   which equals Z_{t+1} = gamma * G @ (Z_t @ (adj^T)^k) + X transposed
#   (F^T F is symmetric up to f32 rounding, so G is reused for G^T).
# --------------------------------------------------------------------------
def mgnni_fused_kernel(ks_ref, f_ref, h_ref, adj_hbm, z_ref, adj_vmem, *,
                       gamma, max_iter, threshold, use_bf16, reapply, check_every):
    i = pl.program_id(0)
    k_i = ks_ref[i]                                       # hop count for this scale (SMEM)

    # Stage adj HBM -> single VMEM buffer (no double buffer).  Done once per
    # scale; one n^2 DMA is negligible next to the fixed-point solve.
    pltpu.sync_copy(adj_hbm, adj_vmem)

    Fm = f_ref[...]                                       # (nhid, nhid)
    FF = jnp.dot(Fm.T, Fm, preferred_element_type=jnp.float32)
    G = FF / (jnp.sqrt(jnp.sum(FF * FF)) + 1e-12)

    H = h_ref[...]                                        # (n, nhid) f32 (== MGNNI input X^T)
    gam = jnp.float32(gamma)
    # MXU operands in bf16 when requested; all element-wise math stays f32
    # (v5e has no bf16 VPU/EUP).
    mm_dtype = jnp.bfloat16 if use_bf16 else jnp.float32

    if reapply:
        # Large-n mode: re-apply adj k times per iteration; only the staged adj
        # (plus an optional bf16 cast copy) stays n x n resident.
        A_mm = adj_vmem[...].astype(jnp.bfloat16) if use_bf16 else None

        def apply_hops(W):
            def hop(_, Wc):
                A = A_mm if use_bf16 else adj_vmem[...]
                return jnp.dot(A, Wc.astype(mm_dtype),
                               preferred_element_type=jnp.float32)
            return lax.fori_loop(0, k_i, hop, W)
    else:
        # Small-n mode: precompute adj^k once so each iteration is a single
        # (n, n) @ (n, nhid) matmul.  The power loop runs in the MXU dtype and
        # reads adj straight from the staged buffer, so only the A_k carry adds
        # one more n x n array.
        def pow_body(_, Ap):
            return jnp.dot(Ap, adj_vmem[...].astype(mm_dtype),
                           preferred_element_type=jnp.float32).astype(mm_dtype)

        A_k = lax.fori_loop(0, k_i - 1, pow_body, adj_vmem[...].astype(mm_dtype))

        def apply_hops(W):
            return jnp.dot(A_k, W.astype(mm_dtype), preferred_element_type=jnp.float32)

    def step(W):
        P = apply_hops(W)                                 # (n, nhid) f32, full-M MXU fill
        return gam * jnp.dot(P, G, preferred_element_type=jnp.float32) + H

    thr2 = jnp.float32(threshold) ** 2

    def cond(carry):
        nstep, _, diff2 = carry
        return jnp.logical_and(nstep < max_iter, diff2 >= thr2)

    def body(carry):
        nstep, W, _ = carry
        # Amortized convergence check: `check_every` applications per body,
        # diff reduced only between the last two iterates.  May overshoot the
        # reference by at most check_every-1 converged steps, which only moves
        # W closer to the fixed point.
        W_prev = W
        for _ in range(check_every - 1):
            W_prev = step(W_prev)
        W_new = step(W_prev)
        d = W_new - W_prev
        return nstep + check_every, W_new, jnp.sum(d * d)

    # z1 = f(0) == H exactly, matching the reference's first application to a
    # zero state.
    _, Wf, _ = lax.while_loop(cond, body, (jnp.int32(0), H, jnp.float32(jnp.inf)))
    z_ref[...] = Wf.astype(z_ref.dtype)


def mgnni_fused_forward(F_stack, h, adj, *, ks, gamma, max_iter, threshold,
                        use_bf16=True, reapply_hops=None, check_every=4):
    K, nhid, _ = F_stack.shape
    n = h.shape[0]
    if reapply_hops is None:
        # Re-apply beats precompute when the per-iteration saving k*n^2*nhid over
        # T iterations is cheaper than the one-off (k-1)*n^3 power, i.e. big n.
        reapply_hops = n > max_iter * nhid
    ks_arr = jnp.asarray(ks, dtype=jnp.int32)
    kern = functools.partial(mgnni_fused_kernel, gamma=gamma, max_iter=max_iter,
                             threshold=threshold, use_bf16=use_bf16,
                             reapply=reapply_hops, check_every=check_every)
    return pl.pallas_call(
        kern,
        out_shape=jax.ShapeDtypeStruct((K, n, nhid), jnp.float32),
        grid_spec=pltpu.PrefetchScalarGridSpec(
            num_scalar_prefetch=1,
            grid=(K,),
            in_specs=[pl.BlockSpec((None, nhid, nhid), lambda i, ks_s: (i, 0, 0)),
                      pl.BlockSpec((n, nhid), lambda i, ks_s: (0, 0)),
                      pl.BlockSpec(memory_space=pl.ANY)],      # adj: raw HBM ref
            out_specs=pl.BlockSpec((None, n, nhid), lambda i, ks_s: (i, 0, 0)),
            scratch_shapes=[pltpu.VMEM((n, n), jnp.float32)],  # single adj copy
        ),
        # "parallel" lets v7x split the K scales over its 2 TensorCores (load
        # imbalance possible when hop counts differ; no-op on v5e/v6e).
        compiler_params=pltpu.CompilerParams(
            dimension_semantics=("parallel",),
            vmem_limit_bytes=_vmem_limit_bytes()),
    )(ks_arr, F_stack, h, adj)


# --------------------------------------------------------------------------
# Kernel 3: attention over scales + final linear readout B, tiled over nodes.
# --------------------------------------------------------------------------
def att_readout_kernel(z_ref, wa1t_ref, ba1_ref, wa2row_ref, bT_ref, o_ref, *, K):
    tn = z_ref.shape[1]
    nhid = z_ref.shape[2]
    zall = z_ref[...]                                     # (K, tn, nhid)
    zflat = zall.reshape(K * tn, nhid)

    h = jnp.tanh(jnp.dot(zflat, wa1t_ref[...], preferred_element_type=jnp.float32)
                 + ba1_ref[...])                          # (K*tn, att_hid)
    s_flat = jnp.sum(h * wa2row_ref[...], axis=-1, keepdims=True)   # (K*tn, 1), VPU
    scores = [s_flat[kk * tn:(kk + 1) * tn, :] for kk in range(K)]  # each (tn, 1)

    s_max = scores[0]
    for s in scores[1:]:
        s_max = jnp.maximum(s_max, s)
    exps = [jnp.exp(s - s_max) for s in scores]
    denom = exps[0]
    for e in exps[1:]:
        denom = denom + e
    inv_denom = 1.0 / denom

    emb = (exps[0] * inv_denom) * zall[0]
    for kk in range(1, K):
        emb = emb + (exps[kk] * inv_denom) * zall[kk]

    o_ref[...] = jnp.dot(emb, bT_ref[...], preferred_element_type=jnp.float32).astype(o_ref.dtype)


def att_readout_forward(z_stack, wa1t, ba1, wa2row, bT, *, tn=2048):
    K, n, nhid = z_stack.shape
    att_hid = wa1t.shape[1]
    m_y = bT.shape[1]
    tn = min(tn, n)
    kern = functools.partial(att_readout_kernel, K=K)
    return pl.pallas_call(
        kern,
        out_shape=jax.ShapeDtypeStruct((n, m_y), jnp.float32),
        grid=(pl.cdiv(n, tn),),
        in_specs=[pl.BlockSpec((K, tn, nhid), lambda j: (0, j, 0)),
                  pl.BlockSpec((nhid, att_hid), lambda j: (0, 0)),
                  pl.BlockSpec((1, att_hid), lambda j: (0, 0)),
                  pl.BlockSpec((1, att_hid), lambda j: (0, 0)),
                  pl.BlockSpec((nhid, m_y), lambda j: (0, 0))],
        out_specs=pl.BlockSpec((tn, m_y), lambda j: (j, 0)),
        compiler_params=pltpu.CompilerParams(
            dimension_semantics=("parallel",),
            vmem_limit_bytes=_vmem_limit_bytes()),
    )(z_stack, wa1t, ba1, wa2row, bT)


# --------------------------------------------------------------------------
# Full model forward (Pallas) and pure-JAX reference
# --------------------------------------------------------------------------
def mgnni_m_mlp_forward(params, X, adj, *, ks, gamma, max_iter, threshold,
                        use_bf16_matmul=True, reapply_hops=None, check_every=4,
                        tn_nodes=2048):
    xt = X.T                                              # (n, m_in) — tiny
    h = mlp_forward(xt, params["w1t"], params["b1"], params["w2t"], params["b2"],
                    tn=tn_nodes)                          # (n, nhid) == MGNNI input, transposed
    z_stack = mgnni_fused_forward(params["F_stack"], h, adj, ks=ks, gamma=gamma,
                                  max_iter=max_iter, threshold=threshold,
                                  use_bf16=use_bf16_matmul,
                                  reapply_hops=reapply_hops,
                                  check_every=check_every)          # (K, n, nhid)
    wa2row = params["wa2"].reshape(1, -1)                 # (1, att_hid)
    return att_readout_forward(z_stack, params["wa1t"], params["ba1"],
                               wa2row, params["Bt"], tn=tn_nodes)


def reference_forward(params, X, adj, *, ks, gamma, max_iter, threshold):
    xt = X.T
    h = jnp.maximum(xt @ params["w1t"] + params["b1"], 0.0)
    h = h @ params["w2t"] + params["b2"]
    Xf = h.T
    At = adj.T
    zs = []
    for i, k in enumerate(ks):
        Fm = params["F_stack"][i]
        FF = Fm.T @ Fm
        G = FF / (jnp.sqrt(jnp.sum(FF * FF)) + 1e-12)

        def f(Z, G=G, k=k):
            Zp = Z
            for _ in range(k):
                Zp = Zp @ At
            return gamma * (G @ Zp) + Xf

        z = f(jnp.zeros_like(Xf))

        def cond(c):
            nstep, _, d = c
            return jnp.logical_and(nstep < max_iter, d >= threshold)

        def body(c, f=f):
            nstep, z, _ = c
            zn = f(z)
            return nstep + 1, zn, jnp.sqrt(jnp.sum((z - zn) ** 2))

        _, z, _ = lax.while_loop(cond, body, (jnp.int32(0), z, jnp.float32(jnp.inf)))
        zs.append(z.T)

    scores = [jnp.tanh(zk @ params["wa1t"] + params["ba1"]) @ params["wa2"] for zk in zs]
    s_max = scores[0]
    for s in scores[1:]:
        s_max = jnp.maximum(s_max, s)
    exps = [jnp.exp(s - s_max) for s in scores]
    denom = exps[0]
    for e in exps[1:]:
        denom = denom + e
    emb = jnp.zeros_like(zs[0])
    for e, zk in zip(exps, zs):
        emb = emb + (e / denom) * zk
    return emb @ params["Bt"]


def make_problem(key, *, m_in, n, nhid, m_y, att_hid, K, edge_p=0.05):
    keys = jax.random.split(key, 16)
    params = {
        "w1t": jax.random.normal(keys[0], (m_in, nhid), jnp.float32) / jnp.sqrt(m_in),
        "b1":  jax.random.normal(keys[1], (1, nhid), jnp.float32) * 0.01,
        "w2t": jax.random.normal(keys[2], (nhid, nhid), jnp.float32) / jnp.sqrt(nhid),
        "b2":  jax.random.normal(keys[3], (1, nhid), jnp.float32) * 0.01,
        "F_stack": jnp.stack([jax.random.normal(keys[4 + i], (nhid, nhid), jnp.float32) * 0.1
                              for i in range(K)], axis=0),
        "wa1t": jax.random.normal(keys[8], (nhid, att_hid), jnp.float32) / jnp.sqrt(nhid),
        "ba1":  jax.random.normal(keys[9], (1, att_hid), jnp.float32) * 0.01,
        "wa2":  jax.random.normal(keys[10], (att_hid, 1), jnp.float32) / jnp.sqrt(att_hid),
        "Bt":   jax.random.normal(keys[11], (nhid, m_y), jnp.float32) / jnp.sqrt(nhid),
    }
    X = jax.random.normal(keys[12], (m_in, n), jnp.float32)
    A = (jax.random.uniform(keys[13], (n, n)) < edge_p).astype(jnp.float32)
    A = jnp.maximum(jnp.maximum(A, A.T), jnp.eye(n, dtype=jnp.float32))
    dinv = 1.0 / jnp.sqrt(A.sum(axis=1))
    adj = dinv[:, None] * A * dinv[None, :]
    return params, X, adj


if __name__ == "__main__":
    m_in, nhid, m_y, att_hid = 16, 32, 8, 16
    ks = (1, 2)
    gamma, max_iter, threshold = 0.8, 50, 1e-6
    kw = dict(ks=ks, gamma=gamma, max_iter=max_iter, threshold=threshold)

    key = jax.random.PRNGKey(0)
    key_a, key_b = jax.random.split(key)

    # ---------------- config 1: n = 128 (aligned), default tiling ----------------
    n1 = 128
    params, X, adj = make_problem(key_a, m_in=m_in, n=n1, nhid=nhid, m_y=m_y,
                                  att_hid=att_hid, K=len(ks))
    ref = jax.block_until_ready(reference_forward(params, X, adj, **kw))

    # f32 MXU path, precomputed adj^k -> tight match against the f32 reference.
    out = jax.block_until_ready(
        mgnni_m_mlp_forward(params, X, adj, use_bf16_matmul=False, **kw))
    assert out.shape == (n1, m_y)
    assert jnp.allclose(out, ref, rtol=1e-4, atol=2e-4), float(jnp.max(jnp.abs(out - ref)))

    # f32 MXU path, re-apply-adj-per-hop variant (the large-n code path).
    out_ra = jax.block_until_ready(
        mgnni_m_mlp_forward(params, X, adj, use_bf16_matmul=False,
                            reapply_hops=True, **kw))
    assert jnp.allclose(out_ra, ref, rtol=1e-4, atol=2e-4), float(jnp.max(jnp.abs(out_ra - ref)))

    # Default path (bf16 MXU operands, f32 accumulate / element-wise): the bf16
    # round-trip of the fixed-point iterate perturbs the trajectory, so only
    # sanity-check it here.
    out_bf16 = jax.block_until_ready(mgnni_m_mlp_forward(params, X, adj, **kw))
    assert out_bf16.shape == (n1, m_y)
    assert bool(jnp.all(jnp.isfinite(out_bf16)))

    # ---- config 2: n = 132 (not a multiple of 8, not divisible by node tile) ----
    n2 = 132
    params2, X2, adj2 = make_problem(key_b, m_in=m_in, n=n2, nhid=nhid, m_y=m_y,
                                     att_hid=att_hid, K=len(ks))
    ref2 = jax.block_until_ready(reference_forward(params2, X2, adj2, **kw))
    out2 = jax.block_until_ready(
        mgnni_m_mlp_forward(params2, X2, adj2, use_bf16_matmul=False,
                            tn_nodes=64, **kw))
    assert out2.shape == (n2, m_y)
    assert jnp.allclose(out2, ref2, rtol=1e-4, atol=2e-4), float(jnp.max(jnp.abs(out2 - ref2)))

    print("KERNEL_OK")
</pallas_src>

<mosaic_0001>
module attributes {stable_mosaic.version = 11 : i64} {
  func.func @mlp_kernel(%arg0: i32, %arg1: memref<128x16xf32, #tpu.memory_space<vmem>>, %arg2: memref<16x32xf32, #tpu.memory_space<vmem>>, %arg3: memref<1x32xf32, #tpu.memory_space<vmem>>, %arg4: memref<32x32xf32, #tpu.memory_space<vmem>>, %arg5: memref<1x32xf32, #tpu.memory_space<vmem>>, %arg6: memref<128x32xf32, #tpu.memory_space<vmem>>) attributes {dimension_semantics = [#tpu.dimension_semantics<parallel>], iteration_bounds = array<i64: 1>, scalar_prefetch = 0 : i64, scratch_operands = 0 : i64, tpu.core_type = #tpu.core_type<tc>, window_params = [{transform_indices = @transform_0, window_bounds = array<i64: 128, 16>}, {pipeline_mode = #tpu.pipeline_mode<synchronous>, transform_indices = @transform_1, window_bounds = array<i64: 16, 32>}, {pipeline_mode = #tpu.pipeline_mode<synchronous>, transform_indices = @transform_2, window_bounds = array<i64: 1, 32>}, {pipeline_mode = #tpu.pipeline_mode<synchronous>, transform_indices = @transform_3, window_bounds = array<i64: 32, 32>}, {pipeline_mode = #tpu.pipeline_mode<synchronous>, transform_indices = @transform_4, window_bounds = array<i64: 1, 32>}, {transform_indices = @transform_5, window_bounds = array<i64: 128, 32>}]} {
    %c0 = arith.constant 0 : index
    %c0_0 = arith.constant 0 : index
    %0 = vector.load %arg1[%c0, %c0_0] : memref<128x16xf32, #tpu.memory_space<vmem>>, vector<128x16xf32>
    %c0_1 = arith.constant 0 : index
    %c0_2 = arith.constant 0 : index
    %1 = vector.load %arg2[%c0_1, %c0_2] : memref<16x32xf32, #tpu.memory_space<vmem>>, vector<16x32xf32>
    %cst = arith.constant dense<0.000000e+00> : vector<128x32xf32>
    %2 = tpu.matmul %0, %1, %cst {dimension_numbers = #tpu.dot_dimension_numbers<[1], [0], [0], [1], [0, 0, 1, 1], [], []>} : vector<128x16xf32>, vector<16x32xf32>, vector<128x32xf32> -> vector<128x32xf32>
    %c0_3 = arith.constant 0 : index
    %c0_4 = arith.constant 0 : index
    %3 = vector.load %arg3[%c0_3, %c0_4] : memref<1x32xf32, #tpu.memory_space<vmem>>, vector<1x32xf32>
    %4 = vector.broadcast %3 : vector<1x32xf32> to vector<128x32xf32>
    %5 = arith.addf %2, %4 : vector<128x32xf32>
    %cst_5 = arith.constant 0.000000e+00 : f32
    %6 = vector.broadcast %cst_5 : f32 to vector<128x32xf32>
    %7 = arith.maximumf %5, %6 : vector<128x32xf32>
    %c0_6 = arith.constant 0 : index
    %c0_7 = arith.constant 0 : index
    %8 = vector.load %arg4[%c0_6, %c0_7] : memref<32x32xf32, #tpu.memory_space<vmem>>, vector<32x32xf32>
    %cst_8 = arith.constant dense<0.000000e+00> : vector<128x32xf32>
    %9 = tpu.matmul %7, %8, %cst_8 {dimension_numbers = #tpu.dot_dimension_numbers<[1], [0], [0], [1], [0, 0, 1, 1], [], []>} : vector<128x32xf32>, vector<32x32xf32>, vector<128x32xf32> -> vector<128x32xf32>
    %c0_9 = arith.constant 0 : index
    %c0_10 = arith.constant 0 : index
    %10 = vector.load %arg5[%c0_9, %c0_10] : memref<1x32xf32, #tpu.memory_space<vmem>>, vector<1x32xf32>
    %11 = vector.broadcast %10 : vector<1x32xf32> to vector<128x32xf32>
    %12 = arith.addf %9, %11 : vector<128x32xf32>
    %c0_11 = arith.constant 0 : index
    %c0_12 = arith.constant 0 : index
    %13 = vector.load %arg6[%c0_11, %c0_12] : memref<128x32xf32, #tpu.memory_space<vmem>>, vector<128x32xf32>
    tpu.vector_store %arg6[%c0_11, %c0_12], %12 {strides = array<i32>} : memref<128x32xf32, #tpu.memory_space<vmem>>, vector<128x32xf32>,
    return
  }
  func.func @transform_0(%arg0: i32) -> (i32, i32) {
    %c0_i32 = arith.constant 0 : i32
    %c0_i32_0 = arith.constant 0 : i32
    return %arg0, %c0_i32 : i32, i32
  }
  func.func @transform_1(%arg0: i32) -> (i32, i32) {
    %c0_i32 = arith.constant 0 : i32
    %c0_i32_0 = arith.constant 0 : i32
    %c0_i32_1 = arith.constant 0 : i32
    return %c0_i32, %c0_i32_0 : i32, i32
  }
  func.func @transform_2(%arg0: i32) -> (i32, i32) {
    %c0_i32 = arith.constant 0 : i32
    %c0_i32_0 = arith.constant 0 : i32
    %c0_i32_1 = arith.constant 0 : i32
    return %c0_i32, %c0_i32_0 : i32, i32
  }
  func.func @transform_3(%arg0: i32) -> (i32, i32) {
    %c0_i32 = arith.constant 0 : i32
    %c0_i32_0 = arith.constant 0 : i32
    %c0_i32_1 = arith.constant 0 : i32
    return %c0_i32, %c0_i32_0 : i32, i32
  }
  func.func @transform_4(%arg0: i32) -> (i32, i32) {
    %c0_i32 = arith.constant 0 : i32
    %c0_i32_0 = arith.constant 0 : i32
    %c0_i32_1 = arith.constant 0 : i32
    return %c0_i32, %c0_i32_0 : i32, i32
  }
  func.func @transform_5(%arg0: i32) -> (i32, i32) {
    %c0_i32 = arith.constant 0 : i32
    %c0_i32_0 = arith.constant 0 : i32
    return %arg0, %c0_i32 : i32, i32
  }
}

</mosaic_0001>

<bundles_post_ra>
// kernel: tpu_custom_call.1
= control target key start
LH: loop header
LB: loop body
LE: loop exit
PB: predicated region body
PF: predicated region fallthrough
CT: control target
= control target key end

     0   :  { %vm42_vm0 = vcmask 130048   ;;  %vm180_vm1 = vcmask 261120   ;;  %s570_s1 = inlined_call_operand.vmem [shape: f32[16,32], index: 1, kind: input, shape index: {}]   ;;  %s571_s0 = inlined_call_operand.vmem [shape: f32[128,16], index: 0, kind: input, shape index: {}]   ;;  %s572_s2 = inlined_call_operand.vmem [shape: f32[1,32], index: 2, kind: input, shape index: {}]   ;;  %s573_s3 = inlined_call_operand.vmem [shape: f32[32,32], index: 3, kind: input, shape index: {}]   ;;  %s574_s4 = inlined_call_operand.vmem [shape: f32[1,32], index: 4, kind: input, shape index: {}]   ;;  %s575_s5 = inlined_call_operand.vmem [shape: f32[128,32], index: 5, kind: output, shape index: {}]  }
   0x1   :  { %v37_v0 = vld [vmem:[%s570_s1 + $0x8] sm:$0xff]  ;;  %v36_v1 = vld [vmem:[%s570_s1] sm:$0xff]  ;;  %v22_v4 = vld [vmem:[%s571_s0 + $0x10] sm:$0xff] }
   0x2   :  { %105 = vmatpush.msra.mxu0 %v37_v0  ;;  %v20_v2 = vld [vmem:[%s571_s0] sm:$0xff]  ;;  %346 = vmatpush.msra.mxu3 %v37_v0  ;;  %v21_v3 = vld [vmem:[%s571_s0 + $0x8] sm:$0xff]  ;;  %v23_v5 = vld [vmem:[%s571_s0 + $0x18] sm:$0xff] }
   0x3   :  { %v24_v6 = vld [vmem:[%s571_s0 + $0x20] sm:$0xff]  ;;  %v29_v7 = vld [vmem:[%s571_s0 + $0x48] sm:$0xff]  ;;  %v30_v9 = vld [vmem:[%s571_s0 + $0x50] sm:$0xff] }
   0x4   :  { %106 = vmatpush.msra.mxu0 %v36_v1  ;;  %347 = vmatpush.msra.mxu3 %v36_v1  ;;  %v25_v8 = vld [vmem:[%s571_s0 + $0x28] sm:$0xff]  ;;  %v26_v10 = vld [vmem:[%s571_s0 + $0x30] sm:$0xff]  ;;  %v31_v11 = vld [vmem:[%s571_s0 + $0x58] sm:$0xff] }
   0x5   :  { %314 = vmatmul.msk.f32.vlgmr.msra.gmra.mxu0 %vm42_vm0, %v20_v2  ;;  %323 = vmatmul.msk.f32.vlgmr.msra.gmra.mxu3 %vm42_vm0, %v29_v7  ;;  %v175_v12 = vld [vmem:[%s573_s3 + $0x18] sm:$0xff]  ;;  %v32_v14 = vld [vmem:[%s571_s0 + $0x60] sm:$0xff]  ;;  %v33_v16 = vld [vmem:[%s571_s0 + $0x68] sm:$0xff] }
   0x6   :  { %241 = vmatpush.msra.mxu1 %v175_v12  ;;  %348 = vmatpush.msra.mxu2 %v175_v12  ;;  %v27_v13 = vld [vmem:[%s571_s0 + $0x38] sm:$0xff]  ;;  %v28_v15 = vld [vmem:[%s571_s0 + $0x40] sm:$0xff]  ;;  %v34_v17 = vld [vmem:[%s571_s0 + $0x70] sm:$0xff] }
   0x7   :  { %v35_v18 = vld [vmem:[%s571_s0 + $0x78] sm:$0xff]  ;;  %v174_v19 = vld [vmem:[%s573_s3 + $0x10] sm:$0xff]  ;;  %v173_v20 = vld [vmem:[%s573_s3 + $0x8] sm:$0xff] }
   0x8   :  { %242 = vmatpush.msra.mxu1 %v174_v19  ;;  %349 = vmatpush.msra.mxu2 %v174_v19  ;;  %v172_v21 = vld [vmem:[%s573_s3] sm:$0xff] }
   0x9   :  { %v469_v22 = vld [vmem:[%s572_s2] ss:$0 sm:$0xff] }
   0xa   :  { %243 = vmatpush.msra.mxu1 %v173_v20  ;;  %350 = vmatpush.msra.mxu2 %v173_v20  ;;  %v353_v7 = vld [vmem:[%s574_s4] ss:$0 sm:$0xff] }
   0xc   :  { %244 = vmatpush.msra.mxu1 %v172_v21  ;;  %351 = vmatpush.msra.mxu2 %v172_v21 }
   0xd   :  { %315 = vmatmul.msk.f32.gmra.mxu0 %vm42_vm0, %v21_v3  ;;  %324 = vmatmul.msk.f32.gmra.mxu3 %vm42_vm0, %v30_v9 }
  0x15   :  { %316 = vmatmul.msk.f32.gmra.mxu0 %vm42_vm0, %v22_v4  ;;  %325 = vmatmul.msk.f32.gmra.mxu3 %vm42_vm0, %v31_v11 }
  0x1d   :  { %317 = vmatmul.msk.f32.gmra.mxu0 %vm42_vm0, %v23_v5  ;;  %326 = vmatmul.msk.f32.gmra.mxu3 %vm42_vm0, %v32_v14 }
  0x25   :  { %318 = vmatmul.msk.f32.gmra.mxu0 %vm42_vm0, %v24_v6  ;;  %327 = vmatmul.msk.f32.gmra.mxu3 %vm42_vm0, %v33_v16 }
  0x2d   :  { %319 = vmatmul.msk.f32.gmra.mxu0 %vm42_vm0, %v25_v8  ;;  %328 = vmatmul.msk.f32.gmra.mxu3 %vm42_vm0, %v34_v17 }
  0x35   :  { %320 = vmatmul.msk.f32.gmra.mxu0 %vm42_vm0, %v26_v10  ;;  %329 = vmatmul.msk.f32.gmra.mxu3 %vm42_vm0, %v35_v18 }
  0x3d   :  { %321 = vmatmul.msk.f32.gmra.mxu0 %vm42_vm0, %v27_v13 }
  0x45   :  { %322 = vmatmul.msk.f32.gmra.mxu0 %vm42_vm0, %v28_v15 }
  0x82   :  { %v108_v23 = vpop.f32.mrf.mxu0 }
  0x83   :  { %v109_v24 = vadd.f32 %v469_v22, %v108_v23 }
  0x85   :  { %v156_v25 = vmax.f32 %v109_v24, 0.0 }
  0x87   :  { %330 = vmatmul.msk.f32.vlgmr.msra.gmra.mxu1 %vm180_vm1, %v156_v25 }
  0x88   :  { %v135_v44 = vpop.f32.mrf.mxu3 }
  0x89   :  { %v136_v52 = vadd.f32 %v469_v22, %v135_v44 }
  0x8a   :  { %v111_v26 = vpop.f32.mrf.mxu0 }
  0x8b   :  { %v112_v27 = vadd.f32 %v469_v22, %v111_v26  ;;  %v165_v53 = vmax.f32 %v136_v52, 0.0 }
  0x8d   :  { %v157_v28 = vmax.f32 %v112_v27, 0.0 }
  0x8f   :  { %331 = vmatmul.msk.f32.gmra.mxu1 %vm180_vm1, %v157_v28 }
  0x90   :  { %v138_v49 = vpop.f32.mrf.mxu3 }
  0x91   :  { %v139_v55 = vadd.f32 %v469_v22, %v138_v49 }
  0x92   :  { %v114_v29 = vpop.f32.mrf.mxu0 }
  0x93   :  { %v115_v30 = vadd.f32 %v469_v22, %v114_v29  ;;  %v166_v56 = vmax.f32 %v139_v55, 0.0 }
  0x95   :  { %v158_v31 = vmax.f32 %v115_v30, 0.0 }
  0x97   :  { %332 = vmatmul.msk.f32.gmra.mxu1 %vm180_vm1, %v158_v31 }
  0x98   :  { %v141_v54 = vpop.f32.mrf.mxu3 }
  0x99   :  { %v142_v58 = vadd.f32 %v469_v22, %v141_v54 }
  0x9a   :  { %v117_v32 = vpop.f32.mrf.mxu0 }
  0x9b   :  { %v118_v33 = vadd.f32 %v469_v22, %v117_v32  ;;  %v167_v59 = vmax.f32 %v142_v58, 0.0 }
  0x9d   :  { %v159_v34 = vmax.f32 %v118_v33, 0.0 }
  0x9f   :  { %333 = vmatmul.msk.f32.gmra.mxu1 %vm180_vm1, %v159_v34 }
  0xa0   :  { %v144_v57 = vpop.f32.mrf.mxu3 }
  0xa1   :  { %v145_v60 = vadd.f32 %v469_v22, %v144_v57 }
  0xa2   :  { %v120_v35 = vpop.f32.mrf.mxu0 }
  0xa3   :  { %v121_v36 = vadd.f32 %v469_v22, %v120_v35  ;;  %v168_v62 = vmax.f32 %v145_v60, 0.0 }
  0xa5   :  { %v160_v37 = vmax.f32 %v121_v36, 0.0 }
  0xa7   :  { %334 = vmatmul.msk.f32.gmra.mxu1 %vm180_vm1, %v160_v37 }
  0xa8   :  { %v147_v61 = vpop.f32.mrf.mxu3 }
  0xa9   :  { %v148_v63 = vadd.f32 %v469_v22, %v147_v61 }
  0xaa   :  { %v123_v38 = vpop.f32.mrf.mxu0 }
  0xab   :  { %v124_v39 = vadd.f32 %v469_v22, %v123_v38  ;;  %v169_v1 = vmax.f32 %v148_v63, 0.0 }
  0xad   :  { %v161_v40 = vmax.f32 %v124_v39, 0.0 }
  0xaf   :  { %335 = vmatmul.msk.f32.gmra.mxu1 %vm180_vm1, %v161_v40 }
  0xb0   :  { %v150_v0 = vpop.f32.mrf.mxu3 }
  0xb1   :  { %v151_v2 = vadd.f32 %v469_v22, %v150_v0 }
  0xb2   :  { %v126_v41 = vpop.f32.mrf.mxu0 }
  0xb3   :  { %v127_v42 = vadd.f32 %v469_v22, %v126_v41  ;;  %v170_v3 = vmax.f32 %v151_v2, 0.0 }
  0xb5   :  { %v162_v43 = vmax.f32 %v127_v42, 0.0 }
  0xb7   :  { %336 = vmatmul.msk.f32.gmra.mxu1 %vm180_vm1, %v162_v43 }
  0xb8   :  { %v153_v4 = vpop.f32.mrf.mxu3 }
  0xb9   :  { %v154_v5 = vadd.f32 %v469_v22, %v153_v4 }
  0xba   :  { %v129_v45 = vpop.f32.mrf.mxu0 }
  0xbb   :  { %v130_v46 = vadd.f32 %v469_v22, %v129_v45  ;;  %v171_v6 = vmax.f32 %v154_v5, 0.0 }
  0xbd   :  { %v163_v47 = vmax.f32 %v130_v46, 0.0 }
  0xbf   :  { %337 = vmatmul.msk.f32.gmra.mxu1 %vm180_vm1, %v163_v47 }
  0xc2   :  { %v132_v48 = vpop.f32.mrf.mxu0 }
  0xc3   :  { %v133_v50 = vadd.f32 %v469_v22, %v132_v48 }
  0xc5   :  { %v164_v51 = vmax.f32 %v133_v50, 0.0 }
  0xc7   :  { %338 = vmatmul.msk.f32.vlgmr.msra.gmra.mxu2 %vm180_vm1, %v164_v51 }
  0xcf   :  { %339 = vmatmul.msk.f32.gmra.mxu2 %vm180_vm1, %v165_v53 }
  0xd7   :  { %340 = vmatmul.msk.f32.gmra.mxu2 %vm180_vm1, %v166_v56 }
  0xdf   :  { %341 = vmatmul.msk.f32.gmra.mxu2 %vm180_vm1, %v167_v59 }
  0xe7   :  { %342 = vmatmul.msk.f32.gmra.mxu2 %vm180_vm1, %v168_v62 }
  0xef   :  { %343 = vmatmul.msk.f32.gmra.mxu2 %vm180_vm1, %v169_v1 }
  0xf7   :  { %344 = vmatmul.msk.f32.gmra.mxu2 %vm180_vm1, %v170_v3 }
  0xff   :  { %345 = vmatmul.msk.f32.gmra.mxu2 %vm180_vm1, %v171_v6 }
 0x104   :  { %v246_v8 = vpop.f32.mrf.mxu1 }
 0x105   :  { %v247_v9 = vadd.f32 %v353_v7, %v246_v8 }
 0x107   :  { %294 = vst.msk [vmem:[%s575_s5] sm:$0xff] %vm180_vm1, %v247_v9 }
 0x10c   :  { %v249_v10 = vpop.f32.mrf.mxu1 }
 0x10d   :  { %v250_v11 = vadd.f32 %v353_v7, %v249_v10 }
 0x10f   :  { %295 = vst.msk [vmem:[%s575_s5 + $0x8] sm:$0xff] %vm180_vm1, %v250_v11 }
 0x114   :  { %v252_v12 = vpop.f32.mrf.mxu1 }
 0x115   :  { %v253_v13 = vadd.f32 %v353_v7, %v252_v12 }
 0x117   :  { %296 = vst.msk [vmem:[%s575_s5 + $0x10] sm:$0xff] %vm180_vm1, %v253_v13 }
 0x11c   :  { %v255_v14 = vpop.f32.mrf.mxu1 }
 0x11d   :  { %v256_v15 = vadd.f32 %v353_v7, %v255_v14 }
 0x11f   :  { %297 = vst.msk [vmem:[%s575_s5 + $0x18] sm:$0xff] %vm180_vm1, %v256_v15 }
 0x124   :  { %v258_v16 = vpop.f32.mrf.mxu1 }
 0x125   :  { %v259_v17 = vadd.f32 %v353_v7, %v258_v16 }
 0x127   :  { %298 = vst.msk [vmem:[%s575_s5 + $0x20] sm:$0xff] %vm180_vm1, %v259_v17 }
 0x12c   :  { %v261_v18 = vpop.f32.mrf.mxu1 }
 0x12d   :  { %v262_v19 = vadd.f32 %v353_v7, %v261_v18 }
 0x12f   :  { %299 = vst.msk [vmem:[%s575_s5 + $0x28] sm:$0xff] %vm180_vm1, %v262_v19 }
 0x134   :  { %v264_v20 = vpop.f32.mrf.mxu1 }
 0x135   :  { %v265_v21 = vadd.f32 %v353_v7, %v264_v20 }
 0x137   :  { %300 = vst.msk [vmem:[%s575_s5 + $0x30] sm:$0xff] %vm180_vm1, %v265_v21 }
 0x13c   :  { %v267_v22 = vpop.f32.mrf.mxu1 }
 0x13d   :  { %v268_v23 = vadd.f32 %v353_v7, %v267_v22 }
 0x13f   :  { %301 = vst.msk [vmem:[%s575_s5 + $0x38] sm:$0xff] %vm180_vm1, %v268_v23 }
 0x14a   :  { %v270_v24 = vpop.f32.mrf.mxu2 }
 0x14b   :  { %v271_v25 = vadd.f32 %v353_v7, %v270_v24 }
 0x14d   :  { %302 = vst.msk [vmem:[%s575_s5 + $0x40] sm:$0xff] %vm180_vm1, %v271_v25 }
 0x152   :  { %v273_v26 = vpop.f32.mrf.mxu2 }
 0x153   :  { %v274_v27 = vadd.f32 %v353_v7, %v273_v26 }
 0x155   :  { %303 = vst.msk [vmem:[%s575_s5 + $0x48] sm:$0xff] %vm180_vm1, %v274_v27 }
 0x15a   :  { %v276_v28 = vpop.f32.mrf.mxu2 }
 0x15b   :  { %v277_v29 = vadd.f32 %v353_v7, %v276_v28 }
 0x15d   :  { %304 = vst.msk [vmem:[%s575_s5 + $0x50] sm:$0xff] %vm180_vm1, %v277_v29 }
 0x162   :  { %v279_v30 = vpop.f32.mrf.mxu2 }
 0x163   :  { %v280_v31 = vadd.f32 %v353_v7, %v279_v30 }
 0x165   :  { %305 = vst.msk [vmem:[%s575_s5 + $0x58] sm:$0xff] %vm180_vm1, %v280_v31 }
 0x16a   :  { %v282_v32 = vpop.f32.mrf.mxu2 }
 0x16b   :  { %v283_v33 = vadd.f32 %v353_v7, %v282_v32 }
 0x16d   :  { %306 = vst.msk [vmem:[%s575_s5 + $0x60] sm:$0xff] %vm180_vm1, %v283_v33 }
 0x172   :  { %v285_v34 = vpop.f32.mrf.mxu2 }
 0x173   :  { %v286_v35 = vadd.f32 %v353_v7, %v285_v34 }
 0x175   :  { %307 = vst.msk [vmem:[%s575_s5 + $0x68] sm:$0xff] %vm180_vm1, %v286_v35 }
 0x17a   :  { %v288_v36 = vpop.f32.mrf.mxu2 }
 0x17b   :  { %v289_v37 = vadd.f32 %v353_v7, %v288_v36 }
 0x17d   :  { %308 = vst.msk [vmem:[%s575_s5 + $0x70] sm:$0xff] %vm180_vm1, %v289_v37 }
 0x182   :  { %v291_v38 = vpop.f32.mrf.mxu2 }
 0x183   :  { %v292_v39 = vadd.f32 %v353_v7, %v291_v38 }
 0x185   :  { %309 = vst.msk [vmem:[%s575_s5 + $0x78] sm:$0xff] %vm180_vm1, %v292_v39 }

</bundles_post_ra>
